<compile_context>
chip_gen: v7x
topology: tpu7x:2x2x1
jax: 0.10.0
libtpu: 0.0.40
codegen_flags: <defaults>
</compile_context>

<pallas_src>
import functools

import jax
import jax.numpy as jnp
from jax.experimental import pallas as pl
from jax.experimental.pallas import tpu as pltpu


# ----------------------------------------------------------------------------
# Fused kernel: embedding (one-hot MXU matmul) + 4x (valid Conv1d + bias + ReLU)
# All weights (< 10 KB) and inter-layer activations stay in VMEM / vregs.
# ----------------------------------------------------------------------------
def _cnn_fused_kernel(ids_ref, tblT_ref, w1_ref, b1_ref, w2_ref, b2_ref,
                      w3_ref, b3_ref, w4_ref, b4_ref, o_ref, *, K):
    # ids_ref : (1, 1, N) int32 with N = BT*L     tblT_ref: (E, V=26) bf16
    # wi_ref  : (Cout_i, K*Cin_i) bf16            bi_ref  : (Cout_i, 1) f32
    # o_ref   : (1, Cout4, N) f32
    ids = ids_ref[0]                                         # (1, N) int32
    V = tblT_ref.shape[1]
    N = ids.shape[1]

    # Embedding as a one-hot matmul on the MXU, already channels-first (E, N).
    onehot = (jax.lax.broadcasted_iota(jnp.int32, (V, N), 0) == ids
              ).astype(jnp.bfloat16)                         # (V, N), exact in bf16
    x = jnp.dot(tblT_ref[...], onehot,
                preferred_element_type=jnp.float32)          # (E, N) f32

    def conv_relu(x, w_ref, b_ref):
        # x: (Cin, N) f32 fixed-length frame.
        # patches[k*Cin + c, j] = x[c, j + k]  (lane rotation on the XLU slot;
        # wrapped columns only land on positions that are already invalid and
        # get discarded by the wrapper).
        shifted = [x if k == 0 else pltpu.roll(x, N - k, 1) for k in range(K)]
        patches = jnp.concatenate(shifted, axis=0).astype(jnp.bfloat16)
        # Single MXU matmul per layer, contraction depth K*Cin, width BT*L.
        y = jnp.dot(w_ref[...], patches,
                    preferred_element_type=jnp.float32)      # (Cout, N) f32
        y = y + b_ref[...]                                   # (Cout, 1) broadcast
        return jnp.maximum(y, 0.0)                           # ReLU (f32)

    # TODO(synk): training-mode Dropout (stateful PyTorch RNG) not reproduced;
    # dropout is identity (eval mode).
    x = conv_relu(x, w1_ref, b1_ref)
    x = conv_relu(x, w2_ref, b2_ref)
    x = conv_relu(x, w3_ref, b3_ref)
    x = conv_relu(x, w4_ref, b4_ref)

    o_ref[0] = x.astype(o_ref.dtype)                         # lane-dense slab


# ----------------------------------------------------------------------------
# Parameter init (deterministic, mimics PyTorch default shapes)
# ----------------------------------------------------------------------------
def init_params(key, num_channels, embedding_size, kernel_size=15):
    nc2 = num_channels * 2
    layer_dims = [
        (embedding_size, nc2),
        (nc2, num_channels),
        (num_channels, num_channels),
        (num_channels, num_channels),
    ]
    keys = jax.random.split(key, 1 + 2 * len(layer_dims))
    params = {"emb": jax.random.normal(keys[0], (26, embedding_size), jnp.float32)}
    for i, (cin, cout) in enumerate(layer_dims):
        bound = 1.0 / jnp.sqrt(cin * kernel_size)
        # Stored as (K, Cin, Cout): PyTorch weight (Cout, Cin, K) transposed (2,1,0).
        params[f"w{i+1}"] = jax.random.uniform(
            keys[1 + 2 * i], (kernel_size, cin, cout), jnp.float32, -bound, bound
        )
        params[f"b{i+1}"] = jax.random.uniform(
            keys[2 + 2 * i], (1, cout), jnp.float32, -bound, bound
        )
    return params


# ----------------------------------------------------------------------------
# Batch-block size heuristic
# ----------------------------------------------------------------------------
def _choose_block_batch(B, L):
    # Fill the MXU/lane dimension: aim for BT*L >= 256 lanes per grid step ...
    bt = min(B, max(1, pl.cdiv(256, L)))
    # ... but keep >= 2 grid steps when B >= 2 so ("parallel",) can shard
    # blocks across both TensorCores on v7x (no-op on single-TC v5e/v6e).
    while bt > 1 and pl.cdiv(B, bt) < 2:
        bt = (bt + 1) // 2
    return bt


# ----------------------------------------------------------------------------
# Full forward pass (one fused pallas_call)
# ----------------------------------------------------------------------------
def cnn_forward(params, input_seqs, kernel_size=15, block_batch=None):
    B, L = input_seqs.shape
    K = kernel_size
    L_out = L - 4 * (K - 1)
    assert L_out >= 1, "sequence too short for 4 valid convs of k=15"

    BT = block_batch if block_batch is not None else _choose_block_batch(B, L)
    NB = pl.cdiv(B, BT)
    B_pad = NB * BT
    N = BT * L

    # Pad batch to a multiple of BT with token 0; padded rows are discarded.
    ids = input_seqs.astype(jnp.int32)
    if B_pad != B:
        ids = jnp.concatenate([ids, jnp.zeros((B_pad - B, L), jnp.int32)], axis=0)
    ids_flat = ids.reshape(NB, 1, N)          # BT consecutive sequences / block

    # Embedding table transposed to (E, V); bf16 at the MXU inputs.
    tblT = params["emb"].T.astype(jnp.bfloat16)

    # Conv weights flattened to (Cout, K*Cin) matching patches row order
    # (row k*Cin + ci == x[ci, t+k]); biases as (Cout, 1) f32 columns.
    ws, bs = [], []
    for i in range(1, 5):
        w = params[f"w{i}"]                                    # (K, Cin, Cout)
        Kk, Cin, Cout = w.shape
        ws.append(w.reshape(Kk * Cin, Cout).T.astype(jnp.bfloat16))
        bs.append(params[f"b{i}"].T.astype(jnp.float32))
    C4 = ws[3].shape[0]

    kernel = functools.partial(_cnn_fused_kernel, K=K)

    in_specs = [
        pl.BlockSpec((1, 1, N), lambda i: (i, 0, 0)),          # ids block
        pl.BlockSpec(tblT.shape, lambda i: (0, 0)),            # emb^T (resident)
    ]
    for w_flat, b_col in zip(ws, bs):
        in_specs.append(pl.BlockSpec(w_flat.shape, lambda i: (0, 0)))
        in_specs.append(pl.BlockSpec(b_col.shape, lambda i: (0, 0)))

    out_full = pl.pallas_call(
        kernel,
        out_shape=jax.ShapeDtypeStruct((NB, C4, N), jnp.float32),
        grid=(NB,),
        in_specs=in_specs,
        out_specs=pl.BlockSpec((1, C4, N), lambda i: (i, 0, 0)),
        compiler_params=pltpu.CompilerParams(
            dimension_semantics=("parallel",),   # shard batch blocks (v7x 2 TCs)
            vmem_limit_bytes=32 * 1024 * 1024,   # ~few MiB/step peak at default BT
        ),
    )(ids_flat, tblT, ws[0], bs[0], ws[1], bs[1], ws[2], bs[2], ws[3], bs[3])

    # Lane-dense (NB, C4, BT*L) slab -> PyTorch (B, C4, L_out).
    # Pure layout plumbing (reshape/transpose/slice) handled by XLA.
    out = (out_full.reshape(NB, C4, BT, L)
                   .transpose(0, 2, 1, 3)
                   .reshape(B_pad, C4, L))
    return out[:B, :, :L_out]


# ----------------------------------------------------------------------------
# Pure-jnp reference (f32) of the PyTorch forward, for validation.
# ----------------------------------------------------------------------------
def cnn_reference(params, input_seqs, kernel_size=15):
    K = kernel_size
    x = params["emb"][input_seqs]                       # (B, L, E)
    x = jnp.transpose(x, (0, 2, 1))                     # (B, E, L)
    for i in range(1, 5):
        w = params[f"w{i}"]                             # (K, Cin, Cout)
        b = params[f"b{i}"]                             # (1, Cout)
        L_in = x.shape[2]
        L_o = L_in - K + 1
        patches = jnp.stack([x[:, :, k:k + L_o] for k in range(K)], axis=1)
        y = jnp.einsum("bkcl,kco->bol", patches, w) + b.T[None]
        x = jnp.maximum(y, 0.0)
    return x


if __name__ == "__main__":
    # Small shapes consistent with the module: 4 valid convs of k=15 need L >= 57.
    B, L = 2, 64
    num_channels, embedding_size = 4, 8

    key = jax.random.PRNGKey(0)
    k_ids, k_params = jax.random.split(key)
    input_seqs = jax.random.randint(k_ids, (B, L), 0, 26, dtype=jnp.int32)
    params = init_params(k_params, num_channels, embedding_size)

    out = cnn_forward(params, input_seqs)
    jax.block_until_ready(out)

    expected_L_out = L - 4 * 14  # = 8
    assert out.shape == (B, num_channels, expected_L_out), out.shape
    assert out.dtype == jnp.float32

    # Validate against the f32 reference (kernel uses bf16 MXU inputs -> loose tol).
    ref = cnn_reference(params, input_seqs)
    max_err = float(jnp.max(jnp.abs(out - ref)))
    assert jnp.allclose(out, ref, atol=5e-2, rtol=5e-2), max_err

    print("KERNEL_OK")
</pallas_src>

<mosaic_0001>
module attributes {stable_mosaic.version = 11 : i64} {
  func.func @_cnn_fused_kernel(%arg0: i32, %arg1: memref<1x1x64xi32, #tpu.memory_space<vmem>>, %arg2: memref<8x26xbf16, #tpu.memory_space<vmem>>, %arg3: memref<8x120xbf16, #tpu.memory_space<vmem>>, %arg4: memref<8x1xf32, #tpu.memory_space<vmem>>, %arg5: memref<4x120xbf16, #tpu.memory_space<vmem>>, %arg6: memref<4x1xf32, #tpu.memory_space<vmem>>, %arg7: memref<4x60xbf16, #tpu.memory_space<vmem>>, %arg8: memref<4x1xf32, #tpu.memory_space<vmem>>, %arg9: memref<4x60xbf16, #tpu.memory_space<vmem>>, %arg10: memref<4x1xf32, #tpu.memory_space<vmem>>, %arg11: memref<1x4x64xf32, #tpu.memory_space<vmem>>) attributes {dimension_semantics = [#tpu.dimension_semantics<parallel>], iteration_bounds = array<i64: 2>, scalar_prefetch = 0 : i64, scratch_operands = 0 : i64, tpu.core_type = #tpu.core_type<tc>, window_params = [{transform_indices = @transform_0, window_bounds = array<i64: 1, 1, 64>}, {pipeline_mode = #tpu.pipeline_mode<synchronous>, transform_indices = @transform_1, window_bounds = array<i64: 8, 26>}, {pipeline_mode = #tpu.pipeline_mode<synchronous>, transform_indices = @transform_2, window_bounds = array<i64: 8, 120>}, {pipeline_mode = #tpu.pipeline_mode<synchronous>, transform_indices = @transform_3, window_bounds = array<i64: 8, 1>}, {pipeline_mode = #tpu.pipeline_mode<synchronous>, transform_indices = @transform_4, window_bounds = array<i64: 4, 120>}, {pipeline_mode = #tpu.pipeline_mode<synchronous>, transform_indices = @transform_5, window_bounds = array<i64: 4, 1>}, {pipeline_mode = #tpu.pipeline_mode<synchronous>, transform_indices = @transform_6, window_bounds = array<i64: 4, 60>}, {pipeline_mode = #tpu.pipeline_mode<synchronous>, transform_indices = @transform_7, window_bounds = array<i64: 4, 1>}, {pipeline_mode = #tpu.pipeline_mode<synchronous>, transform_indices = @transform_8, window_bounds = array<i64: 4, 60>}, {pipeline_mode = #tpu.pipeline_mode<synchronous>, transform_indices = @transform_9, window_bounds = array<i64: 4, 1>}, {transform_indices = @transform_10, window_bounds = array<i64: 1, 4, 64>}]} {
    %c0 = arith.constant 0 : index
    %c0_0 = arith.constant 0 : index
    %c0_1 = arith.constant 0 : index
    %0 = vector.load %arg1[%c0, %c0_0, %c0_1] : memref<1x1x64xi32, #tpu.memory_space<vmem>>, vector<1x1x64xi32>
    %1 = vector.shape_cast %0 : vector<1x1x64xi32> to vector<1x64xi32>
    %2 = tpu.iota {dimensions = array<i32: 0>} : vector<26x64xi32>
    %3 = vector.broadcast %1 : vector<1x64xi32> to vector<26x64xi32>
    %4 = arith.cmpi eq, %2, %3 : vector<26x64xi32>
    %5 = arith.extui %4 : vector<26x64xi1> to vector<26x64xi32>
    %6 = arith.sitofp %5 : vector<26x64xi32> to vector<26x64xf32>
    %7 = arith.truncf %6 : vector<26x64xf32> to vector<26x64xbf16>
    %c0_2 = arith.constant 0 : index
    %c0_3 = arith.constant 0 : index
    %8 = vector.load %arg2[%c0_2, %c0_3] : memref<8x26xbf16, #tpu.memory_space<vmem>>, vector<8x26xbf16>
    %cst = arith.constant dense<0.000000e+00> : vector<8x64xf32>
    %9 = tpu.matmul %8, %7, %cst {dimension_numbers = #tpu.dot_dimension_numbers<[1], [0], [0], [1], [0, 0, 1, 1], [], []>} : vector<8x26xbf16>, vector<26x64xbf16>, vector<8x64xf32> -> vector<8x64xf32>
    %c63_i32 = arith.constant 63 : i32
    %10 = tpu.dynamic_rotate %9 by %c63_i32 dim 1 : vector<8x64xf32>, i32 -> vector<8x64xf32>
    %c62_i32 = arith.constant 62 : i32
    %11 = tpu.dynamic_rotate %9 by %c62_i32 dim 1 : vector<8x64xf32>, i32 -> vector<8x64xf32>
    %c61_i32 = arith.constant 61 : i32
    %12 = tpu.dynamic_rotate %9 by %c61_i32 dim 1 : vector<8x64xf32>, i32 -> vector<8x64xf32>
    %c60_i32 = arith.constant 60 : i32
    %13 = tpu.dynamic_rotate %9 by %c60_i32 dim 1 : vector<8x64xf32>, i32 -> vector<8x64xf32>
    %c59_i32 = arith.constant 59 : i32
    %14 = tpu.dynamic_rotate %9 by %c59_i32 dim 1 : vector<8x64xf32>, i32 -> vector<8x64xf32>
    %c58_i32 = arith.constant 58 : i32
    %15 = tpu.dynamic_rotate %9 by %c58_i32 dim 1 : vector<8x64xf32>, i32 -> vector<8x64xf32>
    %c57_i32 = arith.constant 57 : i32
    %16 = tpu.dynamic_rotate %9 by %c57_i32 dim 1 : vector<8x64xf32>, i32 -> vector<8x64xf32>
    %c56_i32 = arith.constant 56 : i32
    %17 = tpu.dynamic_rotate %9 by %c56_i32 dim 1 : vector<8x64xf32>, i32 -> vector<8x64xf32>
    %c55_i32 = arith.constant 55 : i32
    %18 = tpu.dynamic_rotate %9 by %c55_i32 dim 1 : vector<8x64xf32>, i32 -> vector<8x64xf32>
    %c54_i32 = arith.constant 54 : i32
    %19 = tpu.dynamic_rotate %9 by %c54_i32 dim 1 : vector<8x64xf32>, i32 -> vector<8x64xf32>
    %c53_i32 = arith.constant 53 : i32
    %20 = tpu.dynamic_rotate %9 by %c53_i32 dim 1 : vector<8x64xf32>, i32 -> vector<8x64xf32>
    %c52_i32 = arith.constant 52 : i32
    %21 = tpu.dynamic_rotate %9 by %c52_i32 dim 1 : vector<8x64xf32>, i32 -> vector<8x64xf32>
    %c51_i32 = arith.constant 51 : i32
    %22 = tpu.dynamic_rotate %9 by %c51_i32 dim 1 : vector<8x64xf32>, i32 -> vector<8x64xf32>
    %c50_i32 = arith.constant 50 : i32
    %23 = tpu.dynamic_rotate %9 by %c50_i32 dim 1 : vector<8x64xf32>, i32 -> vector<8x64xf32>
    %24 = tpu.concatenate %9, %10, %11, %12, %13, %14, %15, %16, %17, %18, %19, %20, %21, %22, %23 in 0 : vector<8x64xf32>, vector<8x64xf32>, vector<8x64xf32>, vector<8x64xf32>, vector<8x64xf32>, vector<8x64xf32>, vector<8x64xf32>, vector<8x64xf32>, vector<8x64xf32>, vector<8x64xf32>, vector<8x64xf32>, vector<8x64xf32>, vector<8x64xf32>, vector<8x64xf32>, vector<8x64xf32> -> vector<120x64xf32>
    %25 = arith.truncf %24 : vector<120x64xf32> to vector<120x64xbf16>
    %c0_4 = arith.constant 0 : index
    %c0_5 = arith.constant 0 : index
    %26 = vector.load %arg3[%c0_4, %c0_5] : memref<8x120xbf16, #tpu.memory_space<vmem>>, vector<8x120xbf16>
    %cst_6 = arith.constant dense<0.000000e+00> : vector<8x64xf32>
    %27 = tpu.matmul %26, %25, %cst_6 {dimension_numbers = #tpu.dot_dimension_numbers<[1], [0], [0], [1], [0, 0, 1, 1], [], []>} : vector<8x120xbf16>, vector<120x64xbf16>, vector<8x64xf32> -> vector<8x64xf32>
    %c0_7 = arith.constant 0 : index
    %c0_8 = arith.constant 0 : index
    %28 = vector.load %arg4[%c0_7, %c0_8] : memref<8x1xf32, #tpu.memory_space<vmem>>, vector<8x1xf32>
    %29 = vector.broadcast %28 : vector<8x1xf32> to vector<8x64xf32>
    %30 = arith.addf %27, %29 : vector<8x64xf32>
    %cst_9 = arith.constant 0.000000e+00 : f32
    %31 = vector.broadcast %cst_9 : f32 to vector<8x64xf32>
    %32 = arith.maximumf %30, %31 : vector<8x64xf32>
    %c63_i32_10 = arith.constant 63 : i32
    %33 = tpu.dynamic_rotate %32 by %c63_i32_10 dim 1 : vector<8x64xf32>, i32 -> vector<8x64xf32>
    %c62_i32_11 = arith.constant 62 : i32
    %34 = tpu.dynamic_rotate %32 by %c62_i32_11 dim 1 : vector<8x64xf32>, i32 -> vector<8x64xf32>
    %c61_i32_12 = arith.constant 61 : i32
    %35 = tpu.dynamic_rotate %32 by %c61_i32_12 dim 1 : vector<8x64xf32>, i32 -> vector<8x64xf32>
    %c60_i32_13 = arith.constant 60 : i32
    %36 = tpu.dynamic_rotate %32 by %c60_i32_13 dim 1 : vector<8x64xf32>, i32 -> vector<8x64xf32>
    %c59_i32_14 = arith.constant 59 : i32
    %37 = tpu.dynamic_rotate %32 by %c59_i32_14 dim 1 : vector<8x64xf32>, i32 -> vector<8x64xf32>
    %c58_i32_15 = arith.constant 58 : i32
    %38 = tpu.dynamic_rotate %32 by %c58_i32_15 dim 1 : vector<8x64xf32>, i32 -> vector<8x64xf32>
    %c57_i32_16 = arith.constant 57 : i32
    %39 = tpu.dynamic_rotate %32 by %c57_i32_16 dim 1 : vector<8x64xf32>, i32 -> vector<8x64xf32>
    %c56_i32_17 = arith.constant 56 : i32
    %40 = tpu.dynamic_rotate %32 by %c56_i32_17 dim 1 : vector<8x64xf32>, i32 -> vector<8x64xf32>
    %c55_i32_18 = arith.constant 55 : i32
    %41 = tpu.dynamic_rotate %32 by %c55_i32_18 dim 1 : vector<8x64xf32>, i32 -> vector<8x64xf32>
    %c54_i32_19 = arith.constant 54 : i32
    %42 = tpu.dynamic_rotate %32 by %c54_i32_19 dim 1 : vector<8x64xf32>, i32 -> vector<8x64xf32>
    %c53_i32_20 = arith.constant 53 : i32
    %43 = tpu.dynamic_rotate %32 by %c53_i32_20 dim 1 : vector<8x64xf32>, i32 -> vector<8x64xf32>
    %c52_i32_21 = arith.constant 52 : i32
    %44 = tpu.dynamic_rotate %32 by %c52_i32_21 dim 1 : vector<8x64xf32>, i32 -> vector<8x64xf32>
    %c51_i32_22 = arith.constant 51 : i32
    %45 = tpu.dynamic_rotate %32 by %c51_i32_22 dim 1 : vector<8x64xf32>, i32 -> vector<8x64xf32>
    %c50_i32_23 = arith.constant 50 : i32
    %46 = tpu.dynamic_rotate %32 by %c50_i32_23 dim 1 : vector<8x64xf32>, i32 -> vector<8x64xf32>
    %47 = tpu.concatenate %32, %33, %34, %35, %36, %37, %38, %39, %40, %41, %42, %43, %44, %45, %46 in 0 : vector<8x64xf32>, vector<8x64xf32>, vector<8x64xf32>, vector<8x64xf32>, vector<8x64xf32>, vector<8x64xf32>, vector<8x64xf32>, vector<8x64xf32>, vector<8x64xf32>, vector<8x64xf32>, vector<8x64xf32>, vector<8x64xf32>, vector<8x64xf32>, vector<8x64xf32>, vector<8x64xf32> -> vector<120x64xf32>
    %48 = arith.truncf %47 : vector<120x64xf32> to vector<120x64xbf16>
    %c0_24 = arith.constant 0 : index
    %c0_25 = arith.constant 0 : index
    %49 = vector.load %arg5[%c0_24, %c0_25] : memref<4x120xbf16, #tpu.memory_space<vmem>>, vector<4x120xbf16>
    %cst_26 = arith.constant dense<0.000000e+00> : vector<4x64xf32>
    %50 = tpu.matmul %49, %48, %cst_26 {dimension_numbers = #tpu.dot_dimension_numbers<[1], [0], [0], [1], [0, 0, 1, 1], [], []>} : vector<4x120xbf16>, vector<120x64xbf16>, vector<4x64xf32> -> vector<4x64xf32>
    %c0_27 = arith.constant 0 : index
    %c0_28 = arith.constant 0 : index
    %51 = vector.load %arg6[%c0_27, %c0_28] : memref<4x1xf32, #tpu.memory_space<vmem>>, vector<4x1xf32>
    %52 = vector.broadcast %51 : vector<4x1xf32> to vector<4x64xf32>
    %53 = arith.addf %50, %52 : vector<4x64xf32>
    %cst_29 = arith.constant 0.000000e+00 : f32
    %54 = vector.broadcast %cst_29 : f32 to vector<4x64xf32>
    %55 = arith.maximumf %53, %54 : vector<4x64xf32>
    %c63_i32_30 = arith.constant 63 : i32
    %56 = tpu.dynamic_rotate %55 by %c63_i32_30 dim 1 : vector<4x64xf32>, i32 -> vector<4x64xf32>
    %c62_i32_31 = arith.constant 62 : i32
    %57 = tpu.dynamic_rotate %55 by %c62_i32_31 dim 1 : vector<4x64xf32>, i32 -> vector<4x64xf32>
    %c61_i32_32 = arith.constant 61 : i32
    %58 = tpu.dynamic_rotate %55 by %c61_i32_32 dim 1 : vector<4x64xf32>, i32 -> vector<4x64xf32>
    %c60_i32_33 = arith.constant 60 : i32
    %59 = tpu.dynamic_rotate %55 by %c60_i32_33 dim 1 : vector<4x64xf32>, i32 -> vector<4x64xf32>
    %c59_i32_34 = arith.constant 59 : i32
    %60 = tpu.dynamic_rotate %55 by %c59_i32_34 dim 1 : vector<4x64xf32>, i32 -> vector<4x64xf32>
    %c58_i32_35 = arith.constant 58 : i32
    %61 = tpu.dynamic_rotate %55 by %c58_i32_35 dim 1 : vector<4x64xf32>, i32 -> vector<4x64xf32>
    %c57_i32_36 = arith.constant 57 : i32
    %62 = tpu.dynamic_rotate %55 by %c57_i32_36 dim 1 : vector<4x64xf32>, i32 -> vector<4x64xf32>
    %c56_i32_37 = arith.constant 56 : i32
    %63 = tpu.dynamic_rotate %55 by %c56_i32_37 dim 1 : vector<4x64xf32>, i32 -> vector<4x64xf32>
    %c55_i32_38 = arith.constant 55 : i32
    %64 = tpu.dynamic_rotate %55 by %c55_i32_38 dim 1 : vector<4x64xf32>, i32 -> vector<4x64xf32>
    %c54_i32_39 = arith.constant 54 : i32
    %65 = tpu.dynamic_rotate %55 by %c54_i32_39 dim 1 : vector<4x64xf32>, i32 -> vector<4x64xf32>
    %c53_i32_40 = arith.constant 53 : i32
    %66 = tpu.dynamic_rotate %55 by %c53_i32_40 dim 1 : vector<4x64xf32>, i32 -> vector<4x64xf32>
    %c52_i32_41 = arith.constant 52 : i32
    %67 = tpu.dynamic_rotate %55 by %c52_i32_41 dim 1 : vector<4x64xf32>, i32 -> vector<4x64xf32>
    %c51_i32_42 = arith.constant 51 : i32
    %68 = tpu.dynamic_rotate %55 by %c51_i32_42 dim 1 : vector<4x64xf32>, i32 -> vector<4x64xf32>
    %c50_i32_43 = arith.constant 50 : i32
    %69 = tpu.dynamic_rotate %55 by %c50_i32_43 dim 1 : vector<4x64xf32>, i32 -> vector<4x64xf32>
    %70 = tpu.concatenate %55, %56, %57, %58, %59, %60, %61, %62, %63, %64, %65, %66, %67, %68, %69 in 0 : vector<4x64xf32>, vector<4x64xf32>, vector<4x64xf32>, vector<4x64xf32>, vector<4x64xf32>, vector<4x64xf32>, vector<4x64xf32>, vector<4x64xf32>, vector<4x64xf32>, vector<4x64xf32>, vector<4x64xf32>, vector<4x64xf32>, vector<4x64xf32>, vector<4x64xf32>, vector<4x64xf32> -> vector<60x64xf32>
    %71 = arith.truncf %70 : vector<60x64xf32> to vector<60x64xbf16>
    %c0_44 = arith.constant 0 : index
    %c0_45 = arith.constant 0 : index
    %72 = vector.load %arg7[%c0_44, %c0_45] : memref<4x60xbf16, #tpu.memory_space<vmem>>, vector<4x60xbf16>
    %cst_46 = arith.constant dense<0.000000e+00> : vector<4x64xf32>
    %73 = tpu.matmul %72, %71, %cst_46 {dimension_numbers = #tpu.dot_dimension_numbers<[1], [0], [0], [1], [0, 0, 1, 1], [], []>} : vector<4x60xbf16>, vector<60x64xbf16>, vector<4x64xf32> -> vector<4x64xf32>
    %c0_47 = arith.constant 0 : index
    %c0_48 = arith.constant 0 : index
    %74 = vector.load %arg8[%c0_47, %c0_48] : memref<4x1xf32, #tpu.memory_space<vmem>>, vector<4x1xf32>
    %75 = vector.broadcast %74 : vector<4x1xf32> to vector<4x64xf32>
    %76 = arith.addf %73, %75 : vector<4x64xf32>
    %cst_49 = arith.constant 0.000000e+00 : f32
    %77 = vector.broadcast %cst_49 : f32 to vector<4x64xf32>
    %78 = arith.maximumf %76, %77 : vector<4x64xf32>
    %c63_i32_50 = arith.constant 63 : i32
    %79 = tpu.dynamic_rotate %78 by %c63_i32_50 dim 1 : vector<4x64xf32>, i32 -> vector<4x64xf32>
    %c62_i32_51 = arith.constant 62 : i32
    %80 = tpu.dynamic_rotate %78 by %c62_i32_51 dim 1 : vector<4x64xf32>, i32 -> vector<4x64xf32>
    %c61_i32_52 = arith.constant 61 : i32
    %81 = tpu.dynamic_rotate %78 by %c61_i32_52 dim 1 : vector<4x64xf32>, i32 -> vector<4x64xf32>
    %c60_i32_53 = arith.constant 60 : i32
    %82 = tpu.dynamic_rotate %78 by %c60_i32_53 dim 1 : vector<4x64xf32>, i32 -> vector<4x64xf32>
    %c59_i32_54 = arith.constant 59 : i32
    %83 = tpu.dynamic_rotate %78 by %c59_i32_54 dim 1 : vector<4x64xf32>, i32 -> vector<4x64xf32>
    %c58_i32_55 = arith.constant 58 : i32
    %84 = tpu.dynamic_rotate %78 by %c58_i32_55 dim 1 : vector<4x64xf32>, i32 -> vector<4x64xf32>
    %c57_i32_56 = arith.constant 57 : i32
    %85 = tpu.dynamic_rotate %78 by %c57_i32_56 dim 1 : vector<4x64xf32>, i32 -> vector<4x64xf32>
    %c56_i32_57 = arith.constant 56 : i32
    %86 = tpu.dynamic_rotate %78 by %c56_i32_57 dim 1 : vector<4x64xf32>, i32 -> vector<4x64xf32>
    %c55_i32_58 = arith.constant 55 : i32
    %87 = tpu.dynamic_rotate %78 by %c55_i32_58 dim 1 : vector<4x64xf32>, i32 -> vector<4x64xf32>
    %c54_i32_59 = arith.constant 54 : i32
    %88 = tpu.dynamic_rotate %78 by %c54_i32_59 dim 1 : vector<4x64xf32>, i32 -> vector<4x64xf32>
    %c53_i32_60 = arith.constant 53 : i32
    %89 = tpu.dynamic_rotate %78 by %c53_i32_60 dim 1 : vector<4x64xf32>, i32 -> vector<4x64xf32>
    %c52_i32_61 = arith.constant 52 : i32
    %90 = tpu.dynamic_rotate %78 by %c52_i32_61 dim 1 : vector<4x64xf32>, i32 -> vector<4x64xf32>
    %c51_i32_62 = arith.constant 51 : i32
    %91 = tpu.dynamic_rotate %78 by %c51_i32_62 dim 1 : vector<4x64xf32>, i32 -> vector<4x64xf32>
    %c50_i32_63 = arith.constant 50 : i32
    %92 = tpu.dynamic_rotate %78 by %c50_i32_63 dim 1 : vector<4x64xf32>, i32 -> vector<4x64xf32>
    %93 = tpu.concatenate %78, %79, %80, %81, %82, %83, %84, %85, %86, %87, %88, %89, %90, %91, %92 in 0 : vector<4x64xf32>, vector<4x64xf32>, vector<4x64xf32>, vector<4x64xf32>, vector<4x64xf32>, vector<4x64xf32>, vector<4x64xf32>, vector<4x64xf32>, vector<4x64xf32>, vector<4x64xf32>, vector<4x64xf32>, vector<4x64xf32>, vector<4x64xf32>, vector<4x64xf32>, vector<4x64xf32> -> vector<60x64xf32>
    %94 = arith.truncf %93 : vector<60x64xf32> to vector<60x64xbf16>
    %c0_64 = arith.constant 0 : index
    %c0_65 = arith.constant 0 : index
    %95 = vector.load %arg9[%c0_64, %c0_65] : memref<4x60xbf16, #tpu.memory_space<vmem>>, vector<4x60xbf16>
    %cst_66 = arith.constant dense<0.000000e+00> : vector<4x64xf32>
    %96 = tpu.matmul %95, %94, %cst_66 {dimension_numbers = #tpu.dot_dimension_numbers<[1], [0], [0], [1], [0, 0, 1, 1], [], []>} : vector<4x60xbf16>, vector<60x64xbf16>, vector<4x64xf32> -> vector<4x64xf32>
    %c0_67 = arith.constant 0 : index
    %c0_68 = arith.constant 0 : index
    %97 = vector.load %arg10[%c0_67, %c0_68] : memref<4x1xf32, #tpu.memory_space<vmem>>, vector<4x1xf32>
    %98 = vector.broadcast %97 : vector<4x1xf32> to vector<4x64xf32>
    %99 = arith.addf %96, %98 : vector<4x64xf32>
    %cst_69 = arith.constant 0.000000e+00 : f32
    %100 = vector.broadcast %cst_69 : f32 to vector<4x64xf32>
    %101 = arith.maximumf %99, %100 : vector<4x64xf32>
    %c0_70 = arith.constant 0 : index
    %c0_71 = arith.constant 0 : index
    %c0_72 = arith.constant 0 : index
    %102 = vector.load %arg11[%c0_70, %c0_71, %c0_72] : memref<1x4x64xf32, #tpu.memory_space<vmem>>, vector<1x4x64xf32>
    %103 = vector.shape_cast %102 : vector<1x4x64xf32> to vector<4x64xf32>
    %104 = vector.shape_cast %101 : vector<4x64xf32> to vector<1x4x64xf32>
    tpu.vector_store %arg11[%c0_70, %c0_71, %c0_72], %104 {strides = array<i32>} : memref<1x4x64xf32, #tpu.memory_space<vmem>>, vector<1x4x64xf32>,
    return
  }
  func.func @transform_0(%arg0: i32) -> (i32, i32, i32) {
    %c0_i32 = arith.constant 0 : i32
    %c0_i32_0 = arith.constant 0 : i32
    %c0_i32_1 = arith.constant 0 : i32
    return %arg0, %c0_i32, %c0_i32_0 : i32, i32, i32
  }
  func.func @transform_1(%arg0: i32) -> (i32, i32) {
    %c0_i32 = arith.constant 0 : i32
    %c0_i32_0 = arith.constant 0 : i32
    %c0_i32_1 = arith.constant 0 : i32
    return %c0_i32, %c0_i32_0 : i32, i32
  }
  func.func @transform_2(%arg0: i32) -> (i32, i32) {
    %c0_i32 = arith.constant 0 : i32
    %c0_i32_0 = arith.constant 0 : i32
    %c0_i32_1 = arith.constant 0 : i32
    return %c0_i32, %c0_i32_0 : i32, i32
  }
  func.func @transform_3(%arg0: i32) -> (i32, i32) {
    %c0_i32 = arith.constant 0 : i32
    %c0_i32_0 = arith.constant 0 : i32
    %c0_i32_1 = arith.constant 0 : i32
    return %c0_i32, %c0_i32_0 : i32, i32
  }
  func.func @transform_4(%arg0: i32) -> (i32, i32) {
    %c0_i32 = arith.constant 0 : i32
    %c0_i32_0 = arith.constant 0 : i32
    %c0_i32_1 = arith.constant 0 : i32
    return %c0_i32, %c0_i32_0 : i32, i32
  }
  func.func @transform_5(%arg0: i32) -> (i32, i32) {
    %c0_i32 = arith.constant 0 : i32
    %c0_i32_0 = arith.constant 0 : i32
    %c0_i32_1 = arith.constant 0 : i32
    return %c0_i32, %c0_i32_0 : i32, i32
  }
  func.func @transform_6(%arg0: i32) -> (i32, i32) {
    %c0_i32 = arith.constant 0 : i32
    %c0_i32_0 = arith.constant 0 : i32
    %c0_i32_1 = arith.constant 0 : i32
    return %c0_i32, %c0_i32_0 : i32, i32
  }
  func.func @transform_7(%arg0: i32) -> (i32, i32) {
    %c0_i32 = arith.constant 0 : i32
    %c0_i32_0 = arith.constant 0 : i32
    %c0_i32_1 = arith.constant 0 : i32
    return %c0_i32, %c0_i32_0 : i32, i32
  }
  func.func @transform_8(%arg0: i32) -> (i32, i32) {
    %c0_i32 = arith.constant 0 : i32
    %c0_i32_0 = arith.constant 0 : i32
    %c0_i32_1 = arith.constant 0 : i32
    return %c0_i32, %c0_i32_0 : i32, i32
  }
  func.func @transform_9(%arg0: i32) -> (i32, i32) {
    %c0_i32 = arith.constant 0 : i32
    %c0_i32_0 = arith.constant 0 : i32
    %c0_i32_1 = arith.constant 0 : i32
    return %c0_i32, %c0_i32_0 : i32, i32
  }
  func.func @transform_10(%arg0: i32) -> (i32, i32, i32) {
    %c0_i32 = arith.constant 0 : i32
    %c0_i32_0 = arith.constant 0 : i32
    %c0_i32_1 = arith.constant 0 : i32
    return %arg0, %c0_i32, %c0_i32_0 : i32, i32, i32
  }
}

</mosaic_0001>

<bundles_post_ra>
// kernel: tpu_custom_call.1
= control target key start
LH: loop header
LB: loop body
LE: loop exit
PB: predicated region body
PF: predicated region fallthrough
CT: control target
= control target key end

     0   :  { %s1537_s0 = inlined_call_operand.vmem [shape: s32[2,1,64], index: 0, kind: input, shape index: {}]   ;;  %s1538_s1 = inlined_call_operand.vmem [shape: bf16[8,26], index: 1, kind: input, shape index: {}]   ;;  %s1539_s2 = inlined_call_operand.vmem [shape: bf16[8,120], index: 2, kind: input, shape index: {}]   ;;  %s1540_s3 = inlined_call_operand.vmem [shape: f32[8,1], index: 3, kind: input, shape index: {}]   ;;  %s1541_s4 = inlined_call_operand.vmem [shape: bf16[4,120], index: 4, kind: input, shape index: {}]   ;;  %s1542_s5 = inlined_call_operand.vmem [shape: f32[4,1], index: 5, kind: input, shape index: {}]   ;;  %s1543_s6 = inlined_call_operand.vmem [shape: bf16[4,60], index: 6, kind: input, shape index: {}]   ;;  %s1544_s7 = inlined_call_operand.vmem [shape: f32[4,1], index: 7, kind: input, shape index: {}]   ;;  %s1545_s8 = inlined_call_operand.vmem [shape: bf16[4,60], index: 8, kind: input, shape index: {}]   ;;  %s1546_s9 = inlined_call_operand.vmem [shape: f32[4,1], index: 9, kind: input, shape index: {}]   ;;  %s1547_s10 = inlined_call_operand.hbm [shape: f32[2,4,64], index: 10, kind: output, shape index: {}]  }
   0x1   :  { %1576 = sst [smem:[#allocation5_spill]] %s1537_s0 }
   0x2   :  { %1577 = sst [smem:[#allocation6_spill]] %s1538_s1 }
   0x3   :  { %1578 = sst [smem:[#allocation7_spill]] %s1539_s2 }
   0x4   :  { %1579 = sst [smem:[#allocation8_spill]] %s1540_s3 }
   0x5   :  { %1580 = sst [smem:[#allocation9_spill]] %s1541_s4 }
   0x6   :  { %1581 = sst [smem:[#allocation10_spill]] %s1542_s5 }
   0x7   :  { %15 = vsyncpa [#allocation3], 0 }
   0x8   :  { %17 = vsyncpa [#allocation3 + $0x1], 0  ;;  %s1278_s13 = smov 0   ;;  %s1280_s14 = smov 0  }
   0x9   :  { %s1282_s15 = smov 0   ;;  %s1284_s16 = smov 0  }
   0xa LB: > { %s1299_s17 = sadd.s32 4294967295, %s1201_s16   ;;  %s955_s18 = sadd.s32 4294967294, %s1201_s16   ;;  %s1201_s16 = sphi %s1284_s16, %s1607_s16   ;;  %s1197_s15 = sphi %s1282_s15, %s1606_s15   ;;  %s1193_s14 = sphi %s1280_s14, %s1605_s14   ;;  %s1189_s13 = sphi %s1278_s13, %s1604_s13  }
   0xb   : > { %s1303_s19 = sadd.s32 1, %s1201_s16   ;;  %s245_s20 = sadd.s32 1, %s1197_s15 }
   0xc   : > { %s242_s21 = ssub.s32 %s1201_s16, %s1303_s19  ;;  %p255_p0 = scmp.ne.s32.totalorder %s1197_s15, %s1193_s14 }
   0xd   : > { %p243_p1 = scmp.eq.s32.totalorder %s242_s21, 0  ;;  %p256_p2 = scmp.eq.s32.totalorder %s1299_s17, 1 }
   0xe   : > { %p261_p3 = scmp.ne.s32.totalorder %s1193_s14, %s1189_s13  ;;  %p262_p4 = scmp.eq.s32.totalorder %s955_s18, 1 }
   0xf   : > { %s1314_s22 = scalar_select %p243_p1, %s1197_s15, %s245_s20  }
  0x10   : > { %p1316_p5 = por %p256_p2, %p255_p0  ;;  %p1320_p6 = por %p262_p4, %p261_p3 }
  0x11   : > { %p958_p7 = scmp.ge.s32.totalorder %s1201_s16, 1  ;;  %p313_p8 = scmp.lt.s32.totalorder %s1201_s16, 3 }
  0x13   : > { %p314_p9 = pnand %p958_p7, %p313_p8 }
  0x14   : > { %p349_p10 = scmp.lt.s32.totalorder (!%p314_p9), %s1299_s17, 1  ;;  %v354_v0 = vlaneseq (!%p314_p9)  ;;  %v1203_v1 = vmov (!%p314_p9), 0.0   ;;  %vm1204_vm0 = vmmov (!%p314_p9), 0   ;;  %s1584_s0 = sld [smem:[#allocation5_spill]] (!%p314_p9)  ;;  %vm382_vm6 = vcmask (!%p314_p9), 1044480  }
  0x15   : > { %317 = sbr.rel (%p314_p9) target bundleno = 2652 (0xa5c), region = 60  ;;  %1007 = vmatprep.subr.bf16.mxu0 (!%p314_p9), %v1203_v1  ;;  %1015 = vmatprep.subr.bf16.mxu1 (!%p314_p9), %v1203_v1  ;;  %v1205_v9 = vmov (!%p314_p9), 1.0|1.0   ;;  %s1585_s1 = sld [smem:[#allocation6_spill]] (!%p314_p9)  ;;  %vm378_vm7 = vcmask (!%p314_p9), 211968   ;;  %vm426_vm8 = vcmask (!%p314_p9), 1048064  }
  0x16   : > { %v355_v2 = vshrl.u32 (!%p314_p9), %v354_v0, 7  ;;  %1011 = vmatprep.mubr.msk.bf16.mxu0 (!%p314_p9), %vm1204_vm0, %v1203_v1  ;;  %1031 = vmatprep.mubr.msk.bf16.mxu1 (!%p314_p9), %vm1204_vm0, %v1203_v1  ;;  %s1564_s11 = smov (!%p314_p9), 64   ;;  %s1550_s12 = smov (!%p314_p9), 125   ;;  %v1219_v22 = vmov (!%p314_p9), 0   ;;  %vm495_vm9 = vcmask (!%p314_p9), 1043456   ;;  %vm491_vm10 = vcmask (!%p314_p9), 982016  }
  0x17   : > { %s1568_s18 = smov (!%p314_p9), 127   ;;  %s1548_s20 = smov (!%p314_p9), 123   ;;  %1137 = vset.pattern.permute.xlu0 (!%p314_p9), %v1219_v22  ;;  %1138 = vset.pattern.permute.xlu1 (!%p314_p9), %v1219_v22  ;;  %vm723_vm11 = vcmask (!%p314_p9), 1045504   ;;  %vm719_vm12 = vcmask (!%p314_p9), 490496   ;;  %vm883_vm13 = vcmask (!%p314_p9), 519168  }
  0x18   : > { %v356_v3 = vadd.s32 (!%p314_p9), 8, %v355_v2  ;;  %v357_v4 = vadd.s32 (!%p314_p9), 16, %v355_v2  ;;  %v358_v5 = vadd.s32 (!%p314_p9), 24, %v355_v2  ;;  %s1566_s21 = smov (!%p314_p9), 126   ;;  %s1554_s26 = smov (!%p314_p9), 124  }
  0x19   : > { %s1556_s27 = smov (!%p314_p9), 119   ;;  %s1558_s29 = smov (!%p314_p9), 117  }
  0x1a   : > { %s1216_s30 = smov (!%p314_p9), 120   ;;  %s1586_s3 = sld [smem:[#allocation8_spill]] (!%p314_p9) }
  0x1b   : > { %v377_v12 = vld [vmem:[%s1585_s1] sm:$0xf] (!%p314_p9)  ;;  %s1587_s2 = sld [smem:[#allocation7_spill]] (!%p314_p9)  ;;  %s1596_s5 = sld [smem:[#allocation10_spill]] (!%p314_p9) }
  0x1c   : > { %s350_s25 = scalar_select %p349_p10, %s1299_s17, 1 }
  0x1d   : > { %s1597_s4 = sld [smem:[#allocation9_spill]]  ;;  %s1599_s1 = smov 126  }
  0x1e   : > { %s351_s28 = scalar_lea.vmem %s1584_s0, %s350_s25  ;;  %s1552_s25 = smov 121  }
  0x1f   : > { %v960_v6 = vld [vmem:[%s351_s28] ss:$0 sm:$0xff]  ;;  %s1570_s28 = smov 122   ;;  %s1595_s0 = smov 115  }
  0x20   : > { %vm363_vm1 = vcmp.eq.s32.totalorder %v355_v2, %v960_v6  ;;  %vm364_vm2 = vcmp.eq.s32.totalorder %v356_v3, %v960_v6  ;;  %vm365_vm3 = vcmp.eq.s32.totalorder %v357_v4, %v960_v6  ;;  %vm366_vm4 = vcmp.eq.s32.totalorder %v358_v5, %v960_v6  ;;  %v485_v21 = vld [vmem:[%s1586_s3] sm:$0xff]  ;;  %s1603_s3 = smov 116  }
  0x21   : > { %vm965_vm5 = vmpackc.low %vm364_vm2, %vm363_vm1  ;;  %v963_v7 = vsel %vm365_vm3, 1.0, %v1203_v1  ;;  %v964_v8 = vsel %vm366_vm4, 1.0, %v1203_v1  ;;  %v484_v46 = vld [vmem:[%s1587_s2] sm:$0xf]  ;;  %s1602_s2 = smov 118  }
  0x22   : > { %1008 = vmatpush3.bf16.msk.msra.mxu0 %vm965_vm5, %v1205_v9  ;;  %v376_v10 = vpack.c.bf16 %v964_v8, %v963_v7  ;;  %v598_v58 = vld [vmem:[%s1596_s5] sm:$0xf] }
  0x23   : > { %1009 = vmatprep.subr.bf16.mxu0 %v1203_v1 }
  0x24   : > { %v384_v11 = vsel %vm382_vm6, %v376_v10, 0 }
  0x26   : > { %1010 = vmatpush3.bf16.msra.mxu0 %v384_v11 }
  0x27   : > { %1035 = vmatprep.subr.bf16.mxu0 %v1203_v1 }
  0x29   : > { %1012 = vmatmul.mubr.msk.bf16.vlgmr.msra.gmra.mrb[0].mxu0 %vm378_vm7, %v377_v12 }
  0x2a   : > { %1051 = vmatprep.mubr.msk.bf16.mxu0 %vm1204_vm0, %v1203_v1 }
  0xfc   : > { %v420_v13 = vpop.f32.mrb[0].mxu0 }
  0xfd   : > { %427 = vrot.lane.b32.xlu0 %v420_v13, %s1564_s11  ;;  %v1013_v14 = vpop.f32.mrb[1].mxu0 }
  0xfe   : > { %v423_v15 = vpop.f32.mrb[2].mxu0 }
  0xff   : > { %v1014_v16 = vpop.f32.mrb[3].mxu0 }
 0x16f   : > { %v428_v17 = vpop.permute.xlu0 %427 }
 0x170   : > { %v429_v18 = vsel %vm426_vm8, %v428_v17, %v420_v13 }
 0x171   : > { %430 = vrot.lane.b32.xlu0 %v429_v18, %s1564_s11 }
 0x1e3   : > { %v431_v19 = vpop.permute.xlu0 %430 }
 0x1e4   : > { %v432_v20 = vsel %vm426_vm8, %v431_v19, %v420_v13  ;;  %v597_v19 = vld [vmem:[%s1597_s4] sm:$0x3] }
 0x1e5   : > { %440 = vrot.lane.b32.xlu0 %v432_v20, %s1550_s12  ;;  %434 = vrot.lane.b32.xlu1 %v432_v20, %s1568_s18  ;;  %s1574_s12 = smov 118  }
 0x1e9   : > { %446 = vrot.lane.b32.xlu0 %v432_v20, %s1548_s20  ;;  %437 = vrot.lane.b32.xlu1 %v432_v20, %s1566_s21  ;;  %s1560_s20 = smov 115  }
 0x1ed   : > { %452 = vrot.lane.b32.xlu0 %v432_v20, %s1552_s25  ;;  %443 = vrot.lane.b32.xlu1 %v432_v20, %s1554_s26  ;;  %s1588_s25 = smov 124   ;;  %s1589_s26 = smov 125  }
 0x1f1   : > { %458 = vrot.lane.b32.xlu0 %v432_v20, %s1556_s27  ;;  %449 = vrot.lane.b32.xlu1 %v432_v20, %s1570_s28  ;;  %s1572_s27 = smov 116  }
 0x1f5   : > { %464 = vrot.lane.b32.xlu0 %v432_v20, %s1558_s29  ;;  %455 = vrot.lane.b32.xlu1 %v432_v20, %s1216_s30  ;;  %s1562_s29 = smov 114  }
 0x1f9   : > { %470 = vrot.lane.b32.xlu0 %v432_v20, %s1560_s20  ;;  %461 = vrot.lane.b32.xlu1 %v432_v20, %s1574_s12  ;;  %s1590_s20 = smov 123  }
 0x1fd   : > { %467 = vrot.lane.b32.xlu1 %v432_v20, %s1572_s27  ;;  %488 = vperm.xlu0 %1137, %v485_v21  }
 0x201   : > { %473 = vrot.lane.b32.xlu1 %v432_v20, %s1562_s29  ;;  %s1591_s29 = smov 121  }
 0x257   : > { %v441_v23 = vpop.permute.xlu0 %440  ;;  %v435_v24 = vpop.permute.xlu1 %434 }
 0x258   : > { %v476_v25 = vpack.c.bf16 %v435_v24, %v420_v13 }
 0x25a   : > { %1016 = vmatpush3.bf16.msra.mxu1 %v476_v25 }
 0x25b   : > { %v447_v26 = vpop.permute.xlu0 %446  ;;  %v438_v27 = vpop.permute.xlu1 %437  ;;  %1017 = vmatprep.subr.bf16.mxu1 %v1203_v1 }
 0x25c   : > { %v477_v28 = vpack.c.bf16 %v441_v23, %v438_v27 }
 0x25e   : > { %1018 = vmatpush3.bf16.msra.mxu1 %v477_v28 }
 0x25f   : > { %v453_v29 = vpop.permute.xlu0 %452  ;;  %v444_v30 = vpop.permute.xlu1 %443  ;;  %1019 = vmatprep.subr.bf16.mxu1 %v1203_v1 }
 0x260   : > { %v478_v31 = vpack.c.bf16 %v447_v26, %v444_v30 }
 0x262   : > { %1020 = vmatpush3.bf16.msra.mxu1 %v478_v31 }
 0x263   : > { %v459_v32 = vpop.permute.xlu0 %458  ;;  %v450_v33 = vpop.permute.xlu1 %449  ;;  %1021 = vmatprep.subr.bf16.mxu1 %v1203_v1 }
 0x264   : > { %v479_v34 = vpack.c.bf16 %v453_v29, %v450_v33 }
 0x266   : > { %1022 = vmatpush3.bf16.msra.mxu1 %v479_v34 }
 0x267   : > { %v456_v35 = vpop.permute.xlu1 %455  ;;  %1023 = vmatprep.subr.bf16.mxu1 %v1203_v1  ;;  %v465_v37 = vpop.permute.xlu0 %464 }
 0x268   : > { %v480_v36 = vpack.c.bf16 %v459_v32, %v456_v35  ;;  %v713_v32 = vld [vmem:[%s1544_s7] sm:$0xf] }
 0x26a   : > { %1024 = vmatpush3.bf16.msra.mxu1 %v480_v36 }
 0x26b   : > { %v462_v38 = vpop.permute.xlu1 %461  ;;  %1025 = vmatprep.subr.bf16.mxu1 %v1203_v1  ;;  %v471_v40 = vpop.permute.xlu0 %470 }
 0x26c   : > { %v481_v39 = vpack.c.bf16 %v465_v37, %v462_v38 }
 0x26e   : > { %1026 = vmatpush3.bf16.msra.mxu1 %v481_v39 }
 0x26f   : > { %v468_v41 = vpop.permute.xlu1 %467  ;;  %1027 = vmatprep.subr.bf16.mxu1 %v1203_v1 }
 0x270   : > { %v482_v42 = vpack.c.bf16 %v471_v40, %v468_v41 }
 0x272   : > { %1028 = vmatpush3.bf16.msra.mxu1 %v482_v42 }
 0x273   : > { %v474_v43 = vpop.permute.xlu1 %473  ;;  %1029 = vmatprep.subr.bf16.mxu1 %v1203_v1 }
 0x274   : > { %v483_v44 = vpack.c.bf16 %v474_v43, %v474_v43 }
 0x276   : > { %v497_v45 = vsel %vm495_vm9, %v483_v44, 0 }
 0x277   : > { %1030 = vmatpush3.bf16.msra.mxu1 %v497_v45 }
 0x278   : > { %1055 = vmatprep.subr.bf16.mxu1 %v1203_v1 }
 0x27a   : > { %1032 = vmatmul.mubr.msk.bf16.vlgmr.msra.gmra.mrb[0].mxu1 %vm491_vm10, %v484_v46 }
 0x27b   : > { %1063 = vmatprep.mubr.msk.bf16.mxu1 %vm1204_vm0, %v1203_v1 }
 0x27c   : > { %v489_v47 = vpop.permute.xlu0 %488 }
 0x34d   : > { %v533_v48 = vpop.f32.mrb[0].mxu1 }
 0x34e   : > { %v534_v49 = vadd.f32 %v533_v48, %v489_v47  ;;  %v1033_v50 = vpop.f32.mrb[1].mxu1 }
 0x34f   : > { %v536_v51 = vpop.f32.mrb[2].mxu1 }
 0x350   : > { %v539_v52 = vmax.f32 %v534_v49, 0.0  ;;  %v1034_v53 = vpop.f32.mrb[3].mxu1 }
 0x352   : > { %540 = vrot.lane.b32.xlu1 %v539_v52, %s1564_s11 }
 0x3c4   : > { %v541_v54 = vpop.permute.xlu1 %540 }
 0x3c5   : > { %v542_v55 = vsel %vm426_vm8, %v541_v54, %v539_v52 }
 0x3c6   : > { %543 = vrot.lane.b32.xlu1 %v542_v55, %s1564_s11  ;;  %s1592_s11 = smov 119  }
 0x438   : > { %v544_v56 = vpop.permute.xlu1 %543 }
 0x439   : > { %v545_v57 = vsel %vm426_vm8, %v544_v56, %v539_v52 }
 0x43a   : > { %550 = vrot.lane.b32.xlu1 %v545_v57, %s1566_s21  ;;  %547 = vrot.lane.b32.xlu0 %v545_v57, %s1568_s18  ;;  %s1593_s21 = smov 117   ;;  %s1594_s18 = smov 114  }
 0x43e   : > { %556 = vrot.lane.b32.xlu1 %v545_v57, %s1588_s25  ;;  %553 = vrot.lane.b32.xlu0 %v545_v57, %s1589_s26 }
 0x442   : > { %562 = vrot.lane.b32.xlu1 %v545_v57, %s1570_s28  ;;  %559 = vrot.lane.b32.xlu0 %v545_v57, %s1590_s20  ;;  %s1600_s28 = smov 127  }
 0x446   : > { %568 = vrot.lane.b32.xlu1 %v545_v57, %s1216_s30  ;;  %565 = vrot.lane.b32.xlu0 %v545_v57, %s1591_s29 }
 0x44a   : > { %574 = vrot.lane.b32.xlu1 %v545_v57, %s1574_s12  ;;  %571 = vrot.lane.b32.xlu0 %v545_v57, %s1592_s11  ;;  %s1601_s12 = smov 122  }
 0x44e   : > { %580 = vrot.lane.b32.xlu1 %v545_v57, %s1572_s27  ;;  %577 = vrot.lane.b32.xlu0 %v545_v57, %s1593_s21  ;;  %s1598_s27 = smov 64  }
 0x452   : > { %586 = vrot.lane.b32.xlu1 %v545_v57, %s1594_s18  ;;  %583 = vrot.lane.b32.xlu0 %v545_v57, %s1595_s0 }
 0x456   : > { %601 = vperm.xlu0 %1137, %v598_v58  }
 0x4ac   : > { %v551_v59 = vpop.permute.xlu1 %550  ;;  %v548_v60 = vpop.permute.xlu0 %547 }
 0x4ad   : > { %v589_v61 = vpack.c.bf16 %v548_v60, %v539_v52 }
 0x4af   : > { %1036 = vmatpush3.bf16.msra.mxu0 %v589_v61 }
 0x4b0   : > { %v557_v62 = vpop.permute.xlu1 %556  ;;  %v554_v63 = vpop.permute.xlu0 %553  ;;  %1037 = vmatprep.subr.bf16.mxu0 %v1203_v1 }
 0x4b1   : > { %v590_v0 = vpack.c.bf16 %v554_v63, %v551_v59  ;;  %v712_v59 = vld [vmem:[%s1543_s6] sm:$0x3] }
 0x4b3   : > { %1038 = vmatpush3.bf16.msra.mxu0 %v590_v0 }
 0x4b4   : > { %v563_v2 = vpop.permute.xlu1 %562  ;;  %v560_v3 = vpop.permute.xlu0 %559  ;;  %1039 = vmatprep.subr.bf16.mxu0 %v1203_v1 }
 0x4b5   : > { %v591_v4 = vpack.c.bf16 %v560_v3, %v557_v62 }
 0x4b7   : > { %1040 = vmatpush3.bf16.msra.mxu0 %v591_v4 }
 0x4b8   : > { %v569_v5 = vpop.permute.xlu1 %568  ;;  %v566_v6 = vpop.permute.xlu0 %565  ;;  %1041 = vmatprep.subr.bf16.mxu0 %v1203_v1 }
 0x4b9   : > { %v592_v7 = vpack.c.bf16 %v566_v6, %v563_v2 }
 0x4bb   : > { %1042 = vmatpush3.bf16.msra.mxu0 %v592_v7 }
 0x4bc   : > { %v575_v8 = vpop.permute.xlu1 %574  ;;  %v572_v9 = vpop.permute.xlu0 %571  ;;  %1043 = vmatprep.subr.bf16.mxu0 %v1203_v1 }
 0x4bd   : > { %v593_v10 = vpack.c.bf16 %v572_v9, %v569_v5  ;;  %v830_v9 = vld [vmem:[%s1546_s9] sm:$0xf] }
 0x4bf   : > { %1044 = vmatpush3.bf16.msra.mxu0 %v593_v10 }
 0x4c0   : > { %v581_v11 = vpop.permute.xlu1 %580  ;;  %v578_v12 = vpop.permute.xlu0 %577  ;;  %1045 = vmatprep.subr.bf16.mxu0 %v1203_v1 }
 0x4c1   : > { %v594_v13 = vpack.c.bf16 %v578_v12, %v575_v8 }
 0x4c3   : > { %1046 = vmatpush3.bf16.msra.mxu0 %v594_v13 }
 0x4c4   : > { %v587_v14 = vpop.permute.xlu1 %586  ;;  %v584_v15 = vpop.permute.xlu0 %583  ;;  %1047 = vmatprep.subr.bf16.mxu0 %v1203_v1 }
 0x4c5   : > { %v595_v16 = vpack.c.bf16 %v584_v15, %v581_v11  ;;  %v596_v17 = vpack.c.bf16 %v587_v14, %v587_v14 }
 0x4c7   : > { %1048 = vmatpush3.bf16.msra.mxu0 %v595_v16  ;;  %v608_v18 = vsel %vm495_vm9, %v596_v17, 0 }
 0x4c8   : > { %1049 = vmatprep.subr.bf16.mxu0 %v1203_v1 }
 0x4cb   : > { %1050 = vmatpush3.bf16.msra.mxu0 %v608_v18 }
 0x4cc   : > { %1067 = vmatprep.subr.bf16.mxu0 %v1203_v1 }
 0x4ce   : > { %1052 = vmatmul.mubr.msk.bf16.vlgmr.msra.gmra.mrb[4].mxu0 %vm491_vm10, %v597_v19 }
 0x4cf   : > { %1075 = vmatprep.mubr.msk.bf16.mxu0 %vm1204_vm0, %v1203_v1 }
 0x4d5   : > { %v602_v20 = vpop.permute.xlu0 %601 }
 0x5a1   : > { %v644_v21 = vpop.f32.mrb[4].mxu0 }
 0x5a2   : > { %v645_v22 = vadd.f32 %v644_v21, %v602_v20  ;;  %v1053_v23 = vpop.f32.mrb[5].mxu0 }
 0x5a3   : > { %v647_v24 = vpop.f32.mrb[6].mxu0 }
 0x5a4   : > { %v650_v25 = vmax.f32 %v645_v22, 0.0  ;;  %v1054_v26 = vpop.f32.mrb[7].mxu0 }
 0x5a6   : > { %651 = vrot.lane.b32.xlu1 %v650_v25, %s1598_s27 }
 0x618   : > { %v652_v27 = vpop.permute.xlu1 %651 }
 0x619   : > { %v653_v28 = vsel %vm426_vm8, %v652_v27, %v650_v25 }
 0x61a   : > { %654 = vrot.lane.b32.xlu0 %v653_v28, %s1598_s27 }
 0x68c   : > { %v655_v29 = vpop.permute.xlu0 %654 }
 0x68d   : > { %v656_v30 = vsel %vm426_vm8, %v655_v29, %v650_v25 }
 0x68e   : > { %v658_v31 = vrot.slane %v656_v30, 4  ;;  %662 = vrot.lane.b32.xlu0 %v656_v30, %s1599_s1 }
 0x690   : > { %659 = vrot.lane.b32.xlu1 %v658_v31, %s1600_s28 }
 0x692   : > { %668 = vrot.lane.b32.xlu0 %v656_v30, %s1588_s25 }
 0x694   : > { %665 = vrot.lane.b32.xlu1 %v658_v31, %s1589_s26 }
 0x696   : > { %674 = vrot.lane.b32.xlu0 %v656_v30, %s1601_s12 }
 0x698   : > { %671 = vrot.lane.b32.xlu1 %v658_v31, %s1590_s20 }
 0x69a   : > { %680 = vrot.lane.b32.xlu0 %v656_v30, %s1216_s30 }
 0x69c   : > { %677 = vrot.lane.b32.xlu1 %v658_v31, %s1591_s29 }
 0x69e   : > { %686 = vrot.lane.b32.xlu0 %v656_v30, %s1602_s2 }
 0x6a0   : > { %683 = vrot.lane.b32.xlu1 %v658_v31, %s1592_s11 }
 0x6a2   : > { %692 = vrot.lane.b32.xlu0 %v656_v30, %s1603_s3 }
 0x6a4   : > { %689 = vrot.lane.b32.xlu1 %v658_v31, %s1593_s21 }
 0x6a6   : > { %698 = vrot.lane.b32.xlu0 %v656_v30, %s1594_s18 }
 0x6a8   : > { %695 = vrot.lane.b32.xlu1 %v658_v31, %s1595_s0 }
 0x6ac   : > { %716 = vperm.xlu1 %1138, %v713_v32  }
 0x700   : > { %v663_v33 = vpop.permute.xlu0 %662 }
 0x702   : > { %v660_v34 = vpop.permute.xlu1 %659 }
 0x703   : > { %v701_v37 = vsel %vm495_vm9, %v650_v25, %v660_v34 }
 0x704   : > { %v669_v35 = vpop.permute.xlu0 %668 }
 0x706   : > { %v666_v36 = vpop.permute.xlu1 %665 }
 0x707   : > { %v702_v38 = vsel %vm495_vm9, %v663_v33, %v666_v36  ;;  %v829_v36 = vld [vmem:[%s1545_s8] sm:$0x3] }
 0x708   : > { %v708_v39 = vpack.c.bf16 %v702_v38, %v701_v37  ;;  %v675_v40 = vpop.permute.xlu0 %674 }
 0x70a   : > { %1056 = vmatpush3.bf16.msra.mxu1 %v708_v39  ;;  %v672_v41 = vpop.permute.xlu1 %671 }
 0x70b   : > { %1057 = vmatprep.subr.bf16.mxu1 %v1203_v1  ;;  %v703_v44 = vsel %vm495_vm9, %v669_v35, %v672_v41 }
 0x70c   : > { %v681_v42 = vpop.permute.xlu0 %680 }
 0x70e   : > { %v678_v43 = vpop.permute.xlu1 %677 }
 0x70f   : > { %v704_v45 = vsel %vm495_vm9, %v675_v40, %v678_v43 }
 0x710   : > { %v709_v46 = vpack.c.bf16 %v704_v45, %v703_v44  ;;  %v687_v47 = vpop.permute.xlu0 %686 }
 0x712   : > { %1058 = vmatpush3.bf16.msra.mxu1 %v709_v46  ;;  %v684_v48 = vpop.permute.xlu1 %683 }
 0x713   : > { %1059 = vmatprep.subr.bf16.mxu1 %v1203_v1  ;;  %v705_v51 = vsel %vm495_vm9, %v681_v42, %v684_v48 }
 0x714   : > { %v693_v49 = vpop.permute.xlu0 %692 }
 0x716   : > { %v690_v50 = vpop.permute.xlu1 %689 }
 0x717   : > { %v706_v52 = vsel %vm495_vm9, %v687_v47, %v690_v50 }
 0x718   : > { %v710_v53 = vpack.c.bf16 %v706_v52, %v705_v51  ;;  %v699_v55 = vpop.permute.xlu0 %698 }
 0x71a   : > { %1060 = vmatpush3.bf16.msra.mxu1 %v710_v53  ;;  %v696_v54 = vpop.permute.xlu1 %695 }
 0x71b   : > { %v707_v56 = vsel %vm495_vm9, %v693_v49, %v696_v54  ;;  %1061 = vmatprep.subr.bf16.mxu1 %v1203_v1 }
 0x71c   : > { %v711_v57 = vpack.c.bf16 %v699_v55, %v707_v56 }
 0x71e   : > { %v725_v58 = vsel %vm723_vm11, %v711_v57, 0 }
 0x71f   : > { %1062 = vmatpush3.bf16.msra.mxu1 %v725_v58 }
 0x722   : > { %1064 = vmatmul.mubr.msk.bf16.vlgmr.msra.gmra.mrb[4].mxu1 %vm719_vm12, %v712_v59 }
 0x72b   : > { %v717_v60 = vpop.permute.xlu1 %716 }
 0x7f5   : > { %v761_v61 = vpop.f32.mrb[4].mxu1 }
 0x7f6   : > { %v762_v62 = vadd.f32 %v761_v61, %v717_v60  ;;  %v1065_v63 = vpop.f32.mrb[5].mxu1 }
 0x7f7   : > { %v764_v0 = vpop.f32.mrb[6].mxu1 }
 0x7f8   : > { %v767_v2 = vmax.f32 %v762_v62, 0.0  ;;  %v1066_v3 = vpop.f32.mrb[7].mxu1 }
 0x7fa   : > { %768 = vrot.lane.b32.xlu0 %v767_v2, %s1598_s27 }
 0x86c   : > { %v769_v4 = vpop.permute.xlu0 %768 }
 0x86d   : > { %v770_v5 = vsel %vm426_vm8, %v769_v4, %v767_v2 }
 0x86e   : > { %771 = vrot.lane.b32.xlu1 %v770_v5, %s1598_s27 }
 0x8e0   : > { %v772_v6 = vpop.permute.xlu1 %771 }
 0x8e1   : > { %v773_v7 = vsel %vm426_vm8, %v772_v6, %v767_v2 }
 0x8e2   : > { %v775_v8 = vrot.slane %v773_v7, 4  ;;  %779 = vrot.lane.b32.xlu1 %v773_v7, %s1599_s1  ;;  %s1222_s1 = smov [#allocation2]  }
 0x8e4   : > { %776 = vrot.lane.b32.xlu0 %v775_v8, %s1600_s28  ;;  %s1143_s28 = sshll.u32 %s1222_s1, 4  ;;  %s1144_s28 = int_to_ptr.vmem [resolvable:$false] %s1143_s28 }
 0x8e5   : > { %s1145_s4 = scalar_lea.vmem %s1144_s28, 128 }
 0x8e6   : > { %785 = vrot.lane.b32.xlu1 %v773_v7, %s1588_s25 }
 0x8e8   : > { %782 = vrot.lane.b32.xlu0 %v775_v8, %s1589_s26 }
 0x8ea   : > { %791 = vrot.lane.b32.xlu1 %v773_v7, %s1601_s12 }
 0x8ec   : > { %788 = vrot.lane.b32.xlu0 %v775_v8, %s1590_s20 }
 0x8ee   : > { %797 = vrot.lane.b32.xlu1 %v773_v7, %s1216_s30 }
 0x8f0   : > { %794 = vrot.lane.b32.xlu0 %v775_v8, %s1591_s29 }
 0x8f2   : > { %803 = vrot.lane.b32.xlu1 %v773_v7, %s1602_s2 }
 0x8f4   : > { %800 = vrot.lane.b32.xlu0 %v775_v8, %s1592_s11 }
 0x8f6   : > { %809 = vrot.lane.b32.xlu1 %v773_v7, %s1603_s3  ;;  %s346_s3 = sand.u32 1, %s1193_s14  }
 0x8f7   : > { %s959_s11 = sshll.u32 %s346_s3, 2 }
 0x8f8   : > { %806 = vrot.lane.b32.xlu0 %v775_v8, %s1593_s21  ;;  %s348_s20 = scalar_lea.vmem [#allocation2], %s959_s11 }
 0x8f9   : > { %s899_s21 = sshll.u32 %s348_s20, 4  ;;  %s1497_s21 = int_to_ptr.vmem [resolvable:$true] %s899_s21 }
 0x8fa   : > { %815 = vrot.lane.b32.xlu1 %v773_v7, %s1594_s18  ;;  %s973_s18 = sshll.u32 %s1299_s17, 6  ;;  %s886_s17 = scalar_lea.sflag [#allocation3], %s346_s3 }
 0x8fb   : > { %s1495_s25 = scalar_lea.hbm %s1547_s10, %s973_s18  ;;  %s1139_s26 = scalar_lea.vmem %s1497_s21, 64 }
 0x8fc   : > { %812 = vrot.lane.b32.xlu0 %v775_v8, %s1595_s0  ;;  %p1140_p11 = scmp.ne.s32.totalorder %s1497_s21, %s1139_s26  ;;  %p1146_p0 = scmp.lt.s32.totalorder %s1497_s21, %s1144_s28 }
 0x8fd   : > { %p1147_p1 = scmp.lt.s32.totalorder %s1145_s4, %s1139_s26 }
 0x8fe   : > { %p1141_p12 = pnand %p1140_p11, %p1316_p5 }
 0x8ff   : > { %p1148_p2 = por %p1147_p1, %p1146_p0 }
 0x900   : > { %833 = vperm.xlu0 %1137, %v830_v9   ;;  %p1142_p13 = pneg %p1141_p12 }
 0x902   : > { %p1149_p3 = pnand %p1148_p2, %p1142_p13 }
 0x954   : > { %v780_v10 = vpop.permute.xlu1 %779 }
 0x956   : > { %v777_v11 = vpop.permute.xlu0 %776 }
 0x957   : > { %v818_v14 = vsel %vm495_vm9, %v767_v2, %v777_v11 }
 0x958   : > { %v786_v12 = vpop.permute.xlu1 %785 }
 0x95a   : > { %v783_v13 = vpop.permute.xlu0 %782 }
 0x95b   : > { %v819_v15 = vsel %vm495_vm9, %v780_v10, %v783_v13 }
 0x95c   : > { %v825_v16 = vpack.c.bf16 %v819_v15, %v818_v14  ;;  %v792_v17 = vpop.permute.xlu1 %791 }
 0x95e   : > { %1068 = vmatpush3.bf16.msra.mxu0 %v825_v16  ;;  %v789_v18 = vpop.permute.xlu0 %788 }
 0x95f   : > { %1069 = vmatprep.subr.bf16.mxu0 %v1203_v1  ;;  %v820_v21 = vsel %vm495_vm9, %v786_v12, %v789_v18 }
 0x960   : > { %v798_v19 = vpop.permute.xlu1 %797 }
 0x962   : > { %v795_v20 = vpop.permute.xlu0 %794 }
 0x963   : > { %v821_v22 = vsel %vm495_vm9, %v792_v17, %v795_v20 }
 0x964   : > { %v826_v23 = vpack.c.bf16 %v821_v22, %v820_v21  ;;  %v804_v24 = vpop.permute.xlu1 %803 }
 0x966   : > { %1070 = vmatpush3.bf16.msra.mxu0 %v826_v23  ;;  %v801_v25 = vpop.permute.xlu0 %800 }
 0x967   : > { %1071 = vmatprep.subr.bf16.mxu0 %v1203_v1  ;;  %v822_v28 = vsel %vm495_vm9, %v798_v19, %v801_v25 }
 0x968   : > { %v810_v26 = vpop.permute.xlu1 %809 }
 0x96a   : > { %v807_v27 = vpop.permute.xlu0 %806 }
 0x96b   : > { %v823_v29 = vsel %vm495_vm9, %v804_v24, %v807_v27 }
 0x96c   : > { %v827_v30 = vpack.c.bf16 %v823_v29, %v822_v28  ;;  %v816_v32 = vpop.permute.xlu1 %815 }
 0x96e   : > { %1072 = vmatpush3.bf16.msra.mxu0 %v827_v30  ;;  %v813_v31 = vpop.permute.xlu0 %812 }
 0x96f   : > { %v824_v33 = vsel %vm495_vm9, %v810_v26, %v813_v31  ;;  %1073 = vmatprep.subr.bf16.mxu0 %v1203_v1 }
 0x970   : > { %v828_v34 = vpack.c.bf16 %v816_v32, %v824_v33 }
 0x972   : > { %v840_v35 = vsel %vm723_vm11, %v828_v34, 0 }
 0x973   : > { %1074 = vmatpush3.bf16.msra.mxu0 %v840_v35 }
 0x976   : > { %1076 = vmatmul.mubr.msk.bf16.vlgmr.msra.gmra.mrb[8].mxu0 %vm719_vm12, %v829_v36 }
 0x97f   : > { %v834_v37 = vpop.permute.xlu0 %833 }
 0xa49   : > { %v876_v38 = vpop.f32.mrb[8].mxu0 }
 0xa4a   : > { %v877_v39 = vadd.f32 %v876_v38, %v834_v37  ;;  %v1077_v1 = vpop.f32.mrb[9].mxu0 }
 0xa4b   : > { %v879_v40 = vpop.f32.mrb[10].mxu0 }
 0xa4c   : > { %v882_v41 = vmax.f32 %v877_v39, 0.0  ;;  %v1078_v42 = vpop.f32.mrb[11].mxu0 }
 0xa4e   : > { %884 = vst.msk [vmem:[%s348_s20] sm:$0xf] %vm883_vm13, %v882_v41 }
 0xa4f   : > { %1152 = shalt.err (!%p1149_p3)
}
 0xa50   : > { %s1153_s5 = scalar_lea.hbm %s1495_s25, 64  ;;  %s1157_s0 = scalar_lea.hbm %s1547_s10, 128 }
 0xa51   : > { %p1154_p4 = scmp.ne.s32.totalorder %s1495_s25, %s1153_s5  ;;  %p1158_p9 = scmp.lt.u32.totalorder %s1495_s25, %s1547_s10 }
 0xa52   : > { %p1159_p10 = scmp.lt.u32.totalorder %s1157_s0, %s1153_s5  ;;  %p1161_p12 = scmp.lt.u32.totalorder %s1153_s5, %s1495_s25 }
 0xa53   : > { %p1155_p7 = pnand %p1154_p4, %p1316_p5 }
 0xa54   : > { %p1160_p11 = por %p1159_p10, %p1158_p9 }
 0xa55   : > { %p1156_p8 = pneg %p1155_p7 }
 0xa56   : > { %p1162_p13 = por %p1161_p12, %p1160_p11 }
 0xa58   : > { %p1163_p0 = pnand %p1162_p13, %p1156_p8 }
 0xa5a   : > { %1166 = shalt.err (!%p1163_p0)
}
 0xa5b   : > { %1079 = dma.vmem_to_hbm [thread:$0]  (%p1316_p5), %s1497_s21, 64, %s1495_s25, %s886_s17  }
 0xa5c PF: > { %p1085_p1 = scmp.ge.s32.totalorder %s1201_s16, 2  ;;  %s911_s11 = sand.u32 1, %s1189_s13  }
 0xa5d   : > { %s912_s18 = scalar_lea.sflag [#allocation3], %s911_s11 }
 0xa5e   : > { %p1082_p2 = pnand %p1085_p1, %p1320_p6 }
 0xa60   : > { %1184 = dma.done.wait (!%p1082_p2), %s912_s18, 64  }
 0xa61   : > { %1186 = vsyncadd (!%p1082_p2), %s912_s18, 4294967232  ;;  %p20_p3 = scmp.ge.s32.totalorder %s1303_s19, 4   ;;  %s1604_s13 = smov %s1193_s14 }
 0xa62   : > { %s1605_s14 = smov %s1197_s15  ;;  %s1606_s15 = smov %s1314_s22 }
 0xa63   : > { %s1607_s16 = smov %s1303_s19  ;;  %22 = sbr.rel (!%p20_p3) target bundleno = 10 (0xa), region = 95 }
 0xa6a   :  { %917 = vsyncpa [#allocation3], 1 }
 0xa6b   :  { %919 = vsyncpa [#allocation3 + $0x1], 1 }

</bundles_post_ra>
